<compile_context>
chip_gen: v7x
topology: tpu7x:2x2x1
jax: 0.10.0
libtpu: 0.0.40
codegen_flags: <defaults>
</compile_context>

<pallas_src>
import functools

import jax
import jax.numpy as jnp
from jax.experimental import pallas as pl
from jax.experimental.pallas import tpu as pltpu

LANE = 128


def _round_up(n, m):
    return (n + m - 1) // m * m


def _mlp_kernel(x_ref, w1_ref, b1_ref, w2_ref, b2_ref, w3_ref, b3_ref, o_ref):
    wdt = w1_ref.dtype

    # fc1 + ReLU   (MXU bf16 operands, f32 accumulation; elementwise in f32)
    h1 = jnp.dot(x_ref[...], w1_ref[...], preferred_element_type=jnp.float32)
    h1 = jnp.maximum(h1 + b1_ref[...], 0.0)

    # fc2 + ReLU
    h2 = jnp.dot(h1.astype(wdt), w2_ref[...], preferred_element_type=jnp.float32)
    h2 = jnp.maximum(h2 + b2_ref[...], 0.0)

    # fc3 (padded logit lanes get a ~-inf bias -> exp underflows to 0)
    logits = jnp.dot(h2.astype(wdt), w3_ref[...], preferred_element_type=jnp.float32)
    logits = logits + b3_ref[...]

    # softmax over the class (lane) axis, max-stabilized
    m = jnp.max(logits, axis=-1, keepdims=True)
    e = jnp.exp(logits - m)
    s = jnp.sum(e, axis=-1, keepdims=True)
    o_ref[...] = e * pl.reciprocal(s, approx=True)


@functools.partial(jax.jit, static_argnames=("block_b",))
def feedforward_nn(x, params, *, block_b=256):
    """x: (B, input_size) float32. params: w1,b1,w2,b2,w3,b3 with W stored as (in, out)."""
    w1, b1 = params["w1"], params["b1"]
    w2, b2 = params["w2"], params["b2"]
    w3, b3 = params["w3"], params["b3"]

    B, F = x.shape
    H1, H2, OUT = w1.shape[1], w2.shape[1], w3.shape[1]

    # Pad every contraction / output dim to the 128-lane width.
    F_p, H1_p, H2_p, OUT_p = (_round_up(d, LANE) for d in (F, H1, H2, OUT))

    # Batch tile: multiple of 16 (bf16 sublane packing), capped at block_b.
    B16 = _round_up(B, 16)
    TB = min(block_b, B16)
    B_p = _round_up(B16, TB)

    cdt = jnp.bfloat16  # MXU operand dtype (f32 accumulation inside the kernel)
    f32 = jnp.float32

    x_p = jnp.zeros((B_p, F_p), cdt).at[:B, :F].set(x.astype(cdt))
    w1_p = jnp.zeros((F_p, H1_p), cdt).at[:F, :H1].set(w1.astype(cdt))
    b1_p = jnp.zeros((1, H1_p), f32).at[:, :H1].set(b1.astype(f32))
    w2_p = jnp.zeros((H1_p, H2_p), cdt).at[:H1, :H2].set(w2.astype(cdt))
    b2_p = jnp.zeros((1, H2_p), f32).at[:, :H2].set(b2.astype(f32))
    w3_p = jnp.zeros((H2_p, OUT_p), cdt).at[:H2, :OUT].set(w3.astype(cdt))
    # Padded logit lanes: very negative bias so softmax gives them ~0 weight.
    b3_p = jnp.full((1, OUT_p), -1e30, f32).at[:, :OUT].set(b3.astype(f32))

    grid = (B_p // TB,)

    cost = pl.CostEstimate(
        flops=int(2 * B_p * (F_p * H1_p + H1_p * H2_p + H2_p * OUT_p)),
        transcendentals=int(B_p * (OUT_p + 1)),
        bytes_accessed=int(
            x_p.size * 2
            + (w1_p.size + w2_p.size + w3_p.size) * 2
            + (b1_p.size + b2_p.size + b3_p.size) * 4
            + B_p * OUT_p * 4
        ),
    )

    out = pl.pallas_call(
        _mlp_kernel,
        out_shape=jax.ShapeDtypeStruct((B_p, OUT_p), f32),
        grid=grid,
        in_specs=[
            pl.BlockSpec((TB, F_p), lambda i: (i, 0)),      # x: streamed per batch tile
            pl.BlockSpec((F_p, H1_p), lambda i: (0, 0)),    # weights/biases: VMEM-resident
            pl.BlockSpec((1, H1_p), lambda i: (0, 0)),
            pl.BlockSpec((H1_p, H2_p), lambda i: (0, 0)),
            pl.BlockSpec((1, H2_p), lambda i: (0, 0)),
            pl.BlockSpec((H2_p, OUT_p), lambda i: (0, 0)),
            pl.BlockSpec((1, OUT_p), lambda i: (0, 0)),
        ],
        out_specs=pl.BlockSpec((TB, OUT_p), lambda i: (i, 0)),  # lane-dense output block
        compiler_params=pltpu.CompilerParams(
            dimension_semantics=("parallel",),
        ),
        cost_estimate=cost,
    )(x_p, w1_p, b1_p, w2_p, b2_p, w3_p, b3_p)

    return out[:B, :OUT]


def init_params(key, input_size):
    """Deterministic init mimicking nn.Linear's U(-1/sqrt(fan_in), 1/sqrt(fan_in))."""
    dims = [(input_size, 128), (128, 64), (64, 2)]
    params = {}
    for i, (fan_in, fan_out) in enumerate(dims, start=1):
        key, kw, kb = jax.random.split(key, 3)
        bound = 1.0 / jnp.sqrt(jnp.float32(fan_in))
        params[f"w{i}"] = jax.random.uniform(
            kw, (fan_in, fan_out), jnp.float32, minval=-bound, maxval=bound)
        params[f"b{i}"] = jax.random.uniform(
            kb, (1, fan_out), jnp.float32, minval=-bound, maxval=bound)
    return params


def reference_forward(x, params):
    h1 = jnp.maximum(x @ params["w1"] + params["b1"], 0.0)
    h2 = jnp.maximum(h1 @ params["w2"] + params["b2"], 0.0)
    logits = h2 @ params["w3"] + params["b3"]
    return jax.nn.softmax(logits, axis=1)


if __name__ == "__main__":
    key = jax.random.PRNGKey(0)
    key, kx, kp = jax.random.split(key, 3)

    batch = 8
    input_size = 32  # stand-in for X_train_tensor.shape[1]

    x = jax.random.normal(kx, (batch, input_size), jnp.float32)
    params = init_params(kp, input_size)

    out = feedforward_nn(x, params)
    out = jax.block_until_ready(out)

    ref = reference_forward(x, params)
    assert out.shape == (batch, 2), out.shape
    # bf16 MXU operands + approximate reciprocal -> compare with loose tolerance.
    assert jnp.allclose(out, ref, atol=2e-2, rtol=2e-2), jnp.max(jnp.abs(out - ref))
    assert jnp.allclose(jnp.sum(out, axis=1), 1.0, atol=1e-2)

    print("KERNEL_OK")
</pallas_src>

<mosaic_0001>
module attributes {stable_mosaic.version = 11 : i64} {
  func.func @_mlp_kernel(%arg0: i32, %arg1: memref<16x128xbf16, #tpu.memory_space<vmem>>, %arg2: memref<128x128xbf16, #tpu.memory_space<vmem>>, %arg3: memref<1x128xf32, #tpu.memory_space<vmem>>, %arg4: memref<128x128xbf16, #tpu.memory_space<vmem>>, %arg5: memref<1x128xf32, #tpu.memory_space<vmem>>, %arg6: memref<128x128xbf16, #tpu.memory_space<vmem>>, %arg7: memref<1x128xf32, #tpu.memory_space<vmem>>, %arg8: memref<16x128xf32, #tpu.memory_space<vmem>>) attributes {dimension_semantics = [#tpu.dimension_semantics<parallel>], iteration_bounds = array<i64: 1>, scalar_prefetch = 0 : i64, scratch_operands = 0 : i64, tpu.core_type = #tpu.core_type<tc>, window_params = [{transform_indices = @transform_0, window_bounds = array<i64: 16, 128>}, {pipeline_mode = #tpu.pipeline_mode<synchronous>, transform_indices = @transform_1, window_bounds = array<i64: 128, 128>}, {pipeline_mode = #tpu.pipeline_mode<synchronous>, transform_indices = @transform_2, window_bounds = array<i64: 1, 128>}, {pipeline_mode = #tpu.pipeline_mode<synchronous>, transform_indices = @transform_3, window_bounds = array<i64: 128, 128>}, {pipeline_mode = #tpu.pipeline_mode<synchronous>, transform_indices = @transform_4, window_bounds = array<i64: 1, 128>}, {pipeline_mode = #tpu.pipeline_mode<synchronous>, transform_indices = @transform_5, window_bounds = array<i64: 128, 128>}, {pipeline_mode = #tpu.pipeline_mode<synchronous>, transform_indices = @transform_6, window_bounds = array<i64: 1, 128>}, {transform_indices = @transform_7, window_bounds = array<i64: 16, 128>}]} {
    %c0 = arith.constant 0 : index
    %c0_0 = arith.constant 0 : index
    %0 = vector.load %arg1[%c0, %c0_0] : memref<16x128xbf16, #tpu.memory_space<vmem>>, vector<16x128xbf16>
    %c0_1 = arith.constant 0 : index
    %c0_2 = arith.constant 0 : index
    %1 = vector.load %arg2[%c0_1, %c0_2] : memref<128x128xbf16, #tpu.memory_space<vmem>>, vector<128x128xbf16>
    %cst = arith.constant dense<0.000000e+00> : vector<16x128xf32>
    %2 = tpu.matmul %0, %1, %cst {dimension_numbers = #tpu.dot_dimension_numbers<[1], [0], [0], [1], [0, 0, 1, 1], [], []>} : vector<16x128xbf16>, vector<128x128xbf16>, vector<16x128xf32> -> vector<16x128xf32>
    %c0_3 = arith.constant 0 : index
    %c0_4 = arith.constant 0 : index
    %3 = vector.load %arg3[%c0_3, %c0_4] : memref<1x128xf32, #tpu.memory_space<vmem>>, vector<1x128xf32>
    %4 = vector.broadcast %3 : vector<1x128xf32> to vector<16x128xf32>
    %5 = arith.addf %2, %4 : vector<16x128xf32>
    %cst_5 = arith.constant 0.000000e+00 : f32
    %6 = vector.broadcast %cst_5 : f32 to vector<16x128xf32>
    %7 = arith.maximumf %5, %6 : vector<16x128xf32>
    %8 = arith.truncf %7 : vector<16x128xf32> to vector<16x128xbf16>
    %c0_6 = arith.constant 0 : index
    %c0_7 = arith.constant 0 : index
    %9 = vector.load %arg4[%c0_6, %c0_7] : memref<128x128xbf16, #tpu.memory_space<vmem>>, vector<128x128xbf16>
    %cst_8 = arith.constant dense<0.000000e+00> : vector<16x128xf32>
    %10 = tpu.matmul %8, %9, %cst_8 {dimension_numbers = #tpu.dot_dimension_numbers<[1], [0], [0], [1], [0, 0, 1, 1], [], []>} : vector<16x128xbf16>, vector<128x128xbf16>, vector<16x128xf32> -> vector<16x128xf32>
    %c0_9 = arith.constant 0 : index
    %c0_10 = arith.constant 0 : index
    %11 = vector.load %arg5[%c0_9, %c0_10] : memref<1x128xf32, #tpu.memory_space<vmem>>, vector<1x128xf32>
    %12 = vector.broadcast %11 : vector<1x128xf32> to vector<16x128xf32>
    %13 = arith.addf %10, %12 : vector<16x128xf32>
    %cst_11 = arith.constant 0.000000e+00 : f32
    %14 = vector.broadcast %cst_11 : f32 to vector<16x128xf32>
    %15 = arith.maximumf %13, %14 : vector<16x128xf32>
    %16 = arith.truncf %15 : vector<16x128xf32> to vector<16x128xbf16>
    %c0_12 = arith.constant 0 : index
    %c0_13 = arith.constant 0 : index
    %17 = vector.load %arg6[%c0_12, %c0_13] : memref<128x128xbf16, #tpu.memory_space<vmem>>, vector<128x128xbf16>
    %cst_14 = arith.constant dense<0.000000e+00> : vector<16x128xf32>
    %18 = tpu.matmul %16, %17, %cst_14 {dimension_numbers = #tpu.dot_dimension_numbers<[1], [0], [0], [1], [0, 0, 1, 1], [], []>} : vector<16x128xbf16>, vector<128x128xbf16>, vector<16x128xf32> -> vector<16x128xf32>
    %c0_15 = arith.constant 0 : index
    %c0_16 = arith.constant 0 : index
    %19 = vector.load %arg7[%c0_15, %c0_16] : memref<1x128xf32, #tpu.memory_space<vmem>>, vector<1x128xf32>
    %20 = vector.broadcast %19 : vector<1x128xf32> to vector<16x128xf32>
    %21 = arith.addf %18, %20 : vector<16x128xf32>
    %cst_17 = arith.constant dense<0xFF800000> : vector<16xf32>
    %22 = vector.multi_reduction <maximumf>, %21, %cst_17 [1] : vector<16x128xf32> to vector<16xf32>
    %23 = vector.shape_cast %22 : vector<16xf32> to vector<16x1xf32>
    %24 = vector.broadcast %23 : vector<16x1xf32> to vector<16x128xf32>
    %25 = arith.subf %21, %24 : vector<16x128xf32>
    %26 = math.exp %25 : vector<16x128xf32>
    %cst_18 = arith.constant dense<0.000000e+00> : vector<16xf32>
    %27 = vector.multi_reduction <add>, %26, %cst_18 [1] : vector<16x128xf32> to vector<16xf32>
    %28 = vector.shape_cast %27 : vector<16xf32> to vector<16x1xf32>
    %29 = tpu.reciprocal %28 {approx = true} : vector<16x1xf32> -> vector<16x1xf32>
    %30 = vector.broadcast %29 : vector<16x1xf32> to vector<16x128xf32>
    %31 = arith.mulf %26, %30 : vector<16x128xf32>
    %c0_19 = arith.constant 0 : index
    %c0_20 = arith.constant 0 : index
    %32 = vector.load %arg8[%c0_19, %c0_20] : memref<16x128xf32, #tpu.memory_space<vmem>>, vector<16x128xf32>
    tpu.vector_store %arg8[%c0_19, %c0_20], %31 {strides = array<i32>} : memref<16x128xf32, #tpu.memory_space<vmem>>, vector<16x128xf32>,
    return
  }
  func.func @transform_0(%arg0: i32) -> (i32, i32) {
    %c0_i32 = arith.constant 0 : i32
    %c0_i32_0 = arith.constant 0 : i32
    return %arg0, %c0_i32 : i32, i32
  }
  func.func @transform_1(%arg0: i32) -> (i32, i32) {
    %c0_i32 = arith.constant 0 : i32
    %c0_i32_0 = arith.constant 0 : i32
    %c0_i32_1 = arith.constant 0 : i32
    return %c0_i32, %c0_i32_0 : i32, i32
  }
  func.func @transform_2(%arg0: i32) -> (i32, i32) {
    %c0_i32 = arith.constant 0 : i32
    %c0_i32_0 = arith.constant 0 : i32
    %c0_i32_1 = arith.constant 0 : i32
    return %c0_i32, %c0_i32_0 : i32, i32
  }
  func.func @transform_3(%arg0: i32) -> (i32, i32) {
    %c0_i32 = arith.constant 0 : i32
    %c0_i32_0 = arith.constant 0 : i32
    %c0_i32_1 = arith.constant 0 : i32
    return %c0_i32, %c0_i32_0 : i32, i32
  }
  func.func @transform_4(%arg0: i32) -> (i32, i32) {
    %c0_i32 = arith.constant 0 : i32
    %c0_i32_0 = arith.constant 0 : i32
    %c0_i32_1 = arith.constant 0 : i32
    return %c0_i32, %c0_i32_0 : i32, i32
  }
  func.func @transform_5(%arg0: i32) -> (i32, i32) {
    %c0_i32 = arith.constant 0 : i32
    %c0_i32_0 = arith.constant 0 : i32
    %c0_i32_1 = arith.constant 0 : i32
    return %c0_i32, %c0_i32_0 : i32, i32
  }
  func.func @transform_6(%arg0: i32) -> (i32, i32) {
    %c0_i32 = arith.constant 0 : i32
    %c0_i32_0 = arith.constant 0 : i32
    %c0_i32_1 = arith.constant 0 : i32
    return %c0_i32, %c0_i32_0 : i32, i32
  }
  func.func @transform_7(%arg0: i32) -> (i32, i32) {
    %c0_i32 = arith.constant 0 : i32
    %c0_i32_0 = arith.constant 0 : i32
    return %arg0, %c0_i32 : i32, i32
  }
}

</mosaic_0001>

<bundles_post_ra>
// kernel: feedforward_nn.1
= control target key start
LH: loop header
LB: loop body
LE: loop exit
PB: predicated region body
PF: predicated region fallthrough
CT: control target
= control target key end

     0   :  { %v551_v0 = vmov 0.0   ;;  %vm552_vm0 = vmmov 0   ;;  %s713_s1 = inlined_call_operand.vmem [shape: bf16[128,128], index: 1, kind: input, shape index: {}]   ;;  %s714_s3 = inlined_call_operand.vmem [shape: bf16[128,128], index: 3, kind: input, shape index: {}]   ;;  %s715_s0 = inlined_call_operand.vmem [shape: bf16[16,128], index: 0, kind: input, shape index: {}]   ;;  %s716_s5 = inlined_call_operand.vmem [shape: bf16[128,128], index: 5, kind: input, shape index: {}]   ;;  %s717_s2 = inlined_call_operand.vmem [shape: f32[1,128], index: 2, kind: input, shape index: {}]   ;;  %s718_s4 = inlined_call_operand.vmem [shape: f32[1,128], index: 4, kind: input, shape index: {}]   ;;  %s719_s6 = inlined_call_operand.vmem [shape: f32[1,128], index: 6, kind: input, shape index: {}]   ;;  %s720_s7 = inlined_call_operand.vmem [shape: f32[16,128], index: 7, kind: output, shape index: {}]  }
   0x1   :  { %456 = vmatprep.subr.bf16.mxu0 %v551_v0  ;;  %v518_v1 = vld [vmem:[%s713_s1] sm:$0xff]   ;;  %472 = vmatprep.mubr.msk.bf16.mxu0 %vm552_vm0, %v551_v0  ;;  %v519_v2 = vld [vmem:[%s713_s1 + $0x8] sm:$0xff]   ;;  %v520_v3 = vld [vmem:[%s713_s1 + $0x10] sm:$0xff]  }
   0x2   :  { %476 = vmatprep.subr.bf16.mxu1 %v551_v0  ;;  %492 = vmatprep.mubr.msk.bf16.mxu1 %vm552_vm0, %v551_v0  ;;  %v527_v4 = vld [vmem:[%s714_s3] sm:$0xff]   ;;  %v521_v5 = vld [vmem:[%s713_s1 + $0x18] sm:$0xff]   ;;  %v528_v6 = vld [vmem:[%s714_s3 + $0x8] sm:$0xff]  }
   0x3   :  { %457 = vmatpush3.bf16.msra.mxu0 %v518_v1  ;;  %477 = vmatpush3.bf16.msra.mxu1 %v527_v4  ;;  %v522_v7 = vld [vmem:[%s713_s1 + $0x20] sm:$0xff]   ;;  %v529_v8 = vld [vmem:[%s714_s3 + $0x10] sm:$0xff]   ;;  %v523_v9 = vld [vmem:[%s713_s1 + $0x28] sm:$0xff]  }
   0x4   :  { %458 = vmatprep.subr.bf16.mxu0 %v551_v0  ;;  %478 = vmatprep.subr.bf16.mxu1 %v551_v0  ;;  %v530_v10 = vld [vmem:[%s714_s3 + $0x18] sm:$0xff]   ;;  %v524_v11 = vld [vmem:[%s713_s1 + $0x30] sm:$0xff]   ;;  %v531_v12 = vld [vmem:[%s714_s3 + $0x20] sm:$0xff]  }
   0x5   :  { %v525_v13 = vld [vmem:[%s713_s1 + $0x38] sm:$0xff]   ;;  %v532_v14 = vld [vmem:[%s714_s3 + $0x28] sm:$0xff]   ;;  %v526_v15 = vld [vmem:[%s715_s0] sm:$0xff]  }
   0x6   :  { %v533_v16 = vld [vmem:[%s714_s3 + $0x30] sm:$0xff]   ;;  %v534_v17 = vld [vmem:[%s714_s3 + $0x38] sm:$0xff]   ;;  %v535_v18 = vld [vmem:[%s716_s5] sm:$0xff]  }
   0x7   :  { %459 = vmatpush3.bf16.msra.mxu0 %v519_v2  ;;  %479 = vmatpush3.bf16.msra.mxu1 %v528_v6  ;;  %v536_v19 = vld [vmem:[%s716_s5 + $0x8] sm:$0xff]   ;;  %v537_v20 = vld [vmem:[%s716_s5 + $0x10] sm:$0xff]   ;;  %v538_v21 = vld [vmem:[%s716_s5 + $0x18] sm:$0xff]  }
   0x8   :  { %460 = vmatprep.subr.bf16.mxu0 %v551_v0  ;;  %480 = vmatprep.subr.bf16.mxu1 %v551_v0  ;;  %v539_v22 = vld [vmem:[%s716_s5 + $0x20] sm:$0xff]   ;;  %v540_v23 = vld [vmem:[%s716_s5 + $0x28] sm:$0xff]   ;;  %v541_v34 = vld [vmem:[%s716_s5 + $0x30] sm:$0xff]  }
   0x9   :  { %v401_v24 = vld [vmem:[%s717_s2] ss:$0 sm:$0xff]  ;;  %v542_v35 = vld [vmem:[%s716_s5 + $0x38] sm:$0xff]  }
   0xa   :  { %v411_v36 = vld [vmem:[%s718_s4] ss:$0 sm:$0xff] }
   0xb   :  { %461 = vmatpush3.bf16.msra.mxu0 %v520_v3  ;;  %481 = vmatpush3.bf16.msra.mxu1 %v529_v8  ;;  %v420_v46 = vld [vmem:[%s719_s6] ss:$0 sm:$0xff] }
   0xc   :  { %462 = vmatprep.subr.bf16.mxu0 %v551_v0  ;;  %482 = vmatprep.subr.bf16.mxu1 %v551_v0 }
   0xf   :  { %463 = vmatpush3.bf16.msra.mxu0 %v521_v5  ;;  %483 = vmatpush3.bf16.msra.mxu1 %v530_v10 }
  0x10   :  { %464 = vmatprep.subr.bf16.mxu0 %v551_v0  ;;  %484 = vmatprep.subr.bf16.mxu1 %v551_v0 }
  0x13   :  { %465 = vmatpush3.bf16.msra.mxu0 %v522_v7  ;;  %485 = vmatpush3.bf16.msra.mxu1 %v531_v12 }
  0x14   :  { %466 = vmatprep.subr.bf16.mxu0 %v551_v0  ;;  %486 = vmatprep.subr.bf16.mxu1 %v551_v0 }
  0x17   :  { %467 = vmatpush3.bf16.msra.mxu0 %v523_v9  ;;  %487 = vmatpush3.bf16.msra.mxu1 %v532_v14 }
  0x18   :  { %468 = vmatprep.subr.bf16.mxu0 %v551_v0  ;;  %488 = vmatprep.subr.bf16.mxu1 %v551_v0 }
  0x1b   :  { %469 = vmatpush3.bf16.msra.mxu0 %v524_v11  ;;  %489 = vmatpush3.bf16.msra.mxu1 %v533_v16 }
  0x1c   :  { %470 = vmatprep.subr.bf16.mxu0 %v551_v0  ;;  %490 = vmatprep.subr.bf16.mxu1 %v551_v0 }
  0x1f   :  { %471 = vmatpush3.bf16.msra.mxu0 %v525_v13  ;;  %491 = vmatpush3.bf16.msra.mxu1 %v534_v17 }
  0x20   :  { %496 = vmatprep.subr.bf16.mxu0 %v551_v0 }
  0x22   :  { %473 = vmatmul.mubr.bf16.vlgmr.msra.gmra.mrb[0].mxu0 %v526_v15 }
  0x23   :  { %512 = vmatprep.mubr.msk.bf16.mxu0 %vm552_vm0, %v551_v0  ;;  %497 = vmatpush3.bf16.msra.mxu0 %v535_v18 }
  0x24   :  { %498 = vmatprep.subr.bf16.mxu0 %v551_v0 }
  0x27   :  { %499 = vmatpush3.bf16.msra.mxu0 %v536_v19 }
  0x28   :  { %500 = vmatprep.subr.bf16.mxu0 %v551_v0 }
  0x2b   :  { %501 = vmatpush3.bf16.msra.mxu0 %v537_v20 }
  0x2c   :  { %502 = vmatprep.subr.bf16.mxu0 %v551_v0 }
  0x2f   :  { %503 = vmatpush3.bf16.msra.mxu0 %v538_v21 }
  0x30   :  { %504 = vmatprep.subr.bf16.mxu0 %v551_v0 }
  0x33   :  { %505 = vmatpush3.bf16.msra.mxu0 %v539_v22 }
  0x34   :  { %506 = vmatprep.subr.bf16.mxu0 %v551_v0 }
  0x37   :  { %507 = vmatpush3.bf16.msra.mxu0 %v540_v23 }
  0x38   :  { %508 = vmatprep.subr.bf16.mxu0 %v551_v0 }
  0x3b   :  { %509 = vmatpush3.bf16.msra.mxu0 %v541_v34 }
  0x3c   :  { %510 = vmatprep.subr.bf16.mxu0 %v551_v0 }
  0x3f   :  { %511 = vmatpush3.bf16.msra.mxu0 %v542_v35 }
  0xf5   :  { %v140_v25 = vpop.f32.mrb[0].mxu0 }
  0xf6   :  { %v141_v26 = vadd.f32 %v401_v24, %v140_v25  ;;  %v474_v27 = vpop.f32.mrb[1].mxu0 }
  0xf7   :  { %v143_v28 = vpop.f32.mrb[2].mxu0 }
  0xf8   :  { %v144_v29 = vadd.f32 %v401_v24, %v143_v28  ;;  %v475_v30 = vpop.f32.mrb[3].mxu0  ;;  %v147_v31 = vmax.f32 %v141_v26, 0.0 }
  0xfa   :  { %v148_v32 = vmax.f32 %v144_v29, 0.0 }
  0xfc   :  { %v149_v33 = vpack.c.bf16 %v148_v32, %v147_v31 }
  0xfe   :  { %493 = vmatmul.mubr.bf16.vlgmr.msra.gmra.mrb[0].mxu1 %v149_v33 }
 0x1d1   :  { %v255_v37 = vpop.f32.mrb[0].mxu1 }
 0x1d2   :  { %v256_v38 = vadd.f32 %v411_v36, %v255_v37  ;;  %v494_v39 = vpop.f32.mrb[1].mxu1 }
 0x1d3   :  { %v258_v40 = vpop.f32.mrb[2].mxu1 }
 0x1d4   :  { %v259_v41 = vadd.f32 %v411_v36, %v258_v40  ;;  %v495_v42 = vpop.f32.mrb[3].mxu1  ;;  %v262_v43 = vmax.f32 %v256_v38, 0.0 }
 0x1d6   :  { %v263_v44 = vmax.f32 %v259_v41, 0.0 }
 0x1d8   :  { %v264_v45 = vpack.c.bf16 %v263_v44, %v262_v43 }
 0x1da   :  { %513 = vmatmul.mubr.bf16.vlgmr.msra.gmra.mrb[4].mxu0 %v264_v45 }
 0x2ad   :  { %v370_v47 = vpop.f32.mrb[4].mxu0 }
 0x2ae   :  { %v371_v48 = vadd.f32 %v420_v46, %v370_v47  ;;  %v514_v49 = vpop.f32.mrb[5].mxu0 }
 0x2af   :  { %v373_v50 = vpop.f32.mrb[6].mxu0 }
 0x2b0   :  { %377 = vmax.xlane.f32.xlu0 %v371_v48  ;;  %v515_v51 = vpop.f32.mrb[7].mxu0  ;;  %v374_v52 = vadd.f32 %v420_v46, %v373_v50 }
 0x2b4   :  { %379 = vmax.xlane.f32.xlu0 %v374_v52 }
 0x33d   :  { %v378_v53 = vpop.xlane.xlu0 %377 }
 0x33e   :  { %v381_v54 = vsub.f32 %v371_v48, %v378_v53 }
 0x340   :  { %v383_v55 = vmul.f32 1.442695, %v381_v54 }
 0x341   :  { %v380_v56 = vpop.xlane.xlu0 %379 }
 0x342   :  { %543 = vpow2.f32 %v383_v55  ;;  %v382_v57 = vsub.f32 %v374_v52, %v380_v56 }
 0x344   :  { %v385_v58 = vmul.f32 1.442695, %v382_v57 }
 0x346   :  { %545 = vpow2.f32 %v385_v58 }
 0x34c   :  { %v544_v59 = vpop.eup %543 }
 0x34d   :  { %387 = vadd.xlane.f32.xlu1 %v544_v59 }
 0x350   :  { %v546_v60 = vpop.eup %545 }
 0x351   :  { %389 = vadd.xlane.f32.xlu1 %v546_v60 }
 0x3da   :  { %v388_v61 = vpop.xlane.xlu1 %387 }
 0x3db   :  { %547 = vrcp.f32 %v388_v61 }
 0x3de   :  { %v390_v62 = vpop.xlane.xlu1 %389 }
 0x3df   :  { %549 = vrcp.f32 %v390_v62 }
 0x3e5   :  { %v548_v63 = vpop.eup %547 }
 0x3e6   :  { %v393_v0 = vmul.f32 %v548_v63, %v544_v59 }
 0x3e8   :  { %395 = vst [vmem:[%s720_s7] sm:$0xff] %v393_v0 }
 0x3e9   :  { %v550_v1 = vpop.eup %549 }
 0x3ea   :  { %v394_v2 = vmul.f32 %v550_v1, %v546_v60 }
 0x3ec   :  { %396 = vst [vmem:[%s720_s7 + $0x8] sm:$0xff] %v394_v2 }

</bundles_post_ra>
